<compile_context>
chip_gen: v6e
topology: v6e:2x2x1
jax: 0.10.0
libtpu: 0.0.40
codegen_flags: <defaults>
</compile_context>

<pallas_src>
import math

import jax
import jax.numpy as jnp
from jax.experimental import pallas as pl
from jax.experimental.pallas import tpu as pltpu

LANE = 128


def _round_up(x: int, m: int) -> int:
    return (x + m - 1) // m * m


def _make_skynet_kernel(num_hidden: int, p_pad: int):
    """Fused kernel: MLP -> fused (value|policy) head -> softmax / mask fill."""

    def kernel(x_ref, mask_ref, *refs):
        # refs: [w1, b1, ..., wL, bL, w_head, b_head, out_ref]
        n_params = 2 * num_hidden + 2
        params = refs[:n_params]
        (out_ref,) = refs[n_params:]

        h = x_ref[...]  # bf16 (tile_b, F_pad)

        # --- MLP: (Linear + ReLU) x num_hidden ---
        for li in range(num_hidden):
            w = params[2 * li][...]          # bf16 (K_pad, N_pad)
            b = params[2 * li + 1][...]      # f32  (1, N_pad)
            z = jnp.dot(h, w, preferred_element_type=jnp.float32) + b
            h = jnp.maximum(z, 0.0).astype(jnp.bfloat16)
        # TODO(synk): nn.Dropout(p=0.0) is the identity at inference; omitted.

        # --- Fused value|policy head: one MXU push, split on lane slices ---
        w_head = params[2 * num_hidden][...]      # bf16 (H_pad, P_pad + A_pad)
        b_head = params[2 * num_hidden + 1][...]  # f32  (1, P_pad + A_pad)
        logits = jnp.dot(h, w_head, preferred_element_type=jnp.float32) + b_head

        # Value: softmax over the first p_pad lanes (padded lanes carry a
        # -1e30 bias -> exp underflows to 0, row sums unaffected).  Exact
        # divide so rows sum to 1 to f32 precision.
        v_logits = logits[:, :p_pad]
        v_max = jnp.max(v_logits, axis=-1, keepdims=True)
        v_exp = jnp.exp(v_logits - v_max)
        denom = jnp.sum(v_exp, axis=-1, keepdims=True)
        out_ref[:, :p_pad] = v_exp / denom

        # Policy: masked_fill(~mask, -1e10); padded lanes have mask==0 and are
        # sliced off in the wrapper.
        p_logits = logits[:, p_pad:]
        out_ref[:, p_pad:] = jnp.where(mask_ref[...] != 0, p_logits,
                                       jnp.float32(-1e10))

    return kernel


def prepare_skynet_params(params, in_features):
    """One-time weight preparation: lane-pad, fuse heads, cast to bf16.

    params: dict with 'mlp' = [(W, b), ...], 'value' = (Wv, bv),
            'policy' = (Wp, bp); W stored as (in_features, out_features).
    Runs once per model (NOT per forward call).
    """
    mlp_params = params["mlp"]
    wv, bv = params["value"]
    wp, bp = params["policy"]
    players, actions = int(wv.shape[1]), int(wp.shape[1])

    F_pad = _round_up(in_features, LANE)
    P_pad = _round_up(players, LANE)
    A_pad = _round_up(actions, LANE)

    flat_params = []
    in_dim, in_pad = in_features, F_pad
    for (w, b) in mlp_params:
        out_dim = int(w.shape[1])
        out_pad = _round_up(out_dim, LANE)
        w_p = jnp.zeros((in_pad, out_pad), jnp.float32).at[:in_dim, :out_dim].set(w)
        b_p = jnp.zeros((1, out_pad), jnp.float32).at[0, :out_dim].set(b)
        flat_params.append(w_p.astype(jnp.bfloat16))
        flat_params.append(b_p)
        in_dim, in_pad = out_dim, out_pad

    # Fused value|policy head weights/bias.
    head_w = jnp.zeros((in_pad, P_pad + A_pad), jnp.float32)
    head_w = head_w.at[:in_dim, :players].set(wv)
    head_w = head_w.at[:in_dim, P_pad:P_pad + actions].set(wp)
    head_b = jnp.zeros((1, P_pad + A_pad), jnp.float32)
    head_b = head_b.at[0, :players].set(bv)
    head_b = head_b.at[0, players:P_pad].set(-1e30)  # kill padded softmax lanes
    head_b = head_b.at[0, P_pad:P_pad + actions].set(bp)
    flat_params.append(head_w.astype(jnp.bfloat16))
    flat_params.append(head_b)

    flat_params = tuple(jax.device_put(p) for p in flat_params)
    return dict(
        flat_params=flat_params,
        num_hidden=len(mlp_params),
        in_features=in_features,
        players=players,
        actions=actions,
        F_pad=F_pad,
        P_pad=P_pad,
        A_pad=A_pad,
    )


def make_skynet_forward(prepared):
    """Builds a jitted forward(spatial, non_spatial, mask) -> (value, points, policy)."""
    flat_params = prepared["flat_params"]
    num_hidden = prepared["num_hidden"]
    F = prepared["in_features"]
    players, actions = prepared["players"], prepared["actions"]
    F_pad, P_pad, A_pad = prepared["F_pad"], prepared["P_pad"], prepared["A_pad"]
    out_lanes = P_pad + A_pad

    kernel = _make_skynet_kernel(num_hidden, P_pad)
    weight_bytes = sum(int(p.size) * p.dtype.itemsize for p in flat_params)

    @jax.jit
    def forward(spatial, non_spatial, mask):
        B = spatial.shape[0]
        # Glue: 'b p h w c -> b (p h w c)' then concat with non-spatial features.
        x = jnp.concatenate([spatial.reshape(B, -1), non_spatial], axis=1)
        assert x.shape[1] == F, (x.shape, F)

        # --- Batch tiling: multiple of 16 (bf16 sublane pack), capped at 512 ---
        tile_b = min(_round_up(B, 16), 512)

        def tile_budget(tb):
            # double-buffered x/mask/out tiles (bf16/bf16/f32) + 2x resident weights
            return 2 * weight_bytes + 2 * tb * (F_pad * 2 + A_pad * 2 + out_lanes * 4)

        # v7x escape hatch: keep well inside 64 MiB physical VMEM.
        while tile_b > 16 and tile_budget(tile_b) > (48 << 20):
            tile_b = _round_up(tile_b // 2, 16)

        B_pad = _round_up(B, tile_b)
        nb = B_pad // tile_b

        # Pad inputs directly in bf16 (no padded-f32 intermediate in HBM).
        x_pad = (jnp.zeros((B_pad, F_pad), jnp.bfloat16)
                 .at[:B, :F].set(x.astype(jnp.bfloat16)))
        mask_pad = (jnp.zeros((B_pad, A_pad), jnp.bfloat16)
                    .at[:B, :actions].set(mask.astype(jnp.bfloat16)))

        def row_map(i):
            return (i, 0)

        def resident_map(i):
            return (0, 0)  # weights stay resident across batch tiles

        in_specs = [
            pl.BlockSpec((tile_b, F_pad), row_map),
            pl.BlockSpec((tile_b, A_pad), row_map),
        ]
        for p in flat_params:
            in_specs.append(pl.BlockSpec(p.shape, resident_map))

        out_shape = jax.ShapeDtypeStruct((B_pad, out_lanes), jnp.float32)
        out_spec = pl.BlockSpec((tile_b, out_lanes), row_map)

        # 32 MiB scoped VMEM: raises v5e's 16 MiB default, matches v6e/v7x, and
        # comfortably covers the budget computed above.
        vmem_limit = max(32 << 20, min(2 * tile_budget(tile_b), 48 << 20))

        fn = pl.pallas_call(
            kernel,
            out_shape=out_shape,
            grid_spec=pltpu.PrefetchScalarGridSpec(
                num_scalar_prefetch=0,
                grid=(nb,),
                in_specs=in_specs,
                out_specs=out_spec,
            ),
            # Parallel batch axis; harmless on single-TC v5e/v6e.  On v7x,
            # verify in the trace that both TensorCores take grid steps; if
            # not, switch this axis to pltpu.CORE_PARALLEL semantics.
            compiler_params=pltpu.CompilerParams(
                dimension_semantics=("parallel",),
                vmem_limit_bytes=int(vmem_limit)),
        )
        out = fn(x_pad, mask_pad, *flat_params)

        value = out[:B, :players]
        policy = out[:B, P_pad:P_pad + actions]
        points = jnp.zeros_like(value)   # torch.zeros_like(value_out)
        return value, points, policy

    return forward


def reference_forward(spatial, non_spatial, mask, params):
    """Pure-JAX f32 reference mirroring SimpleSkyNet.forward."""
    b = spatial.shape[0]
    x = jnp.concatenate([spatial.reshape(b, -1), non_spatial], axis=1)
    for w, bb in params["mlp"]:
        x = jnp.maximum(x @ w + bb, 0.0)
    wv, bv = params["value"]
    value = jax.nn.softmax(x @ wv + bv, axis=-1)
    wp, bp = params["policy"]
    policy = jnp.where(mask != 0, x @ wp + bp, jnp.float32(-1e10))
    return value, jnp.zeros_like(value), policy


def init_params(key, in_features, hidden_layers, players, actions):
    """Deterministic synthetic init (shapes match the PyTorch module's layers)."""
    params = {"mlp": []}
    dims = [in_features] + hidden_layers
    keys = jax.random.split(key, len(hidden_layers) + 2)
    for i in range(len(hidden_layers)):
        kw, kb = jax.random.split(keys[i])
        w = 0.05 * jax.random.normal(kw, (dims[i], dims[i + 1]), dtype=jnp.float32)
        bb = 0.05 * jax.random.normal(kb, (dims[i + 1],), dtype=jnp.float32)
        params["mlp"].append((w, bb))
    kw, kb = jax.random.split(keys[-2])
    params["value"] = (
        0.05 * jax.random.normal(kw, (hidden_layers[-1], players), dtype=jnp.float32),
        0.05 * jax.random.normal(kb, (players,), dtype=jnp.float32),
    )
    kw, kb = jax.random.split(keys[-1])
    params["policy"] = (
        0.05 * jax.random.normal(kw, (hidden_layers[-1], actions), dtype=jnp.float32),
        0.05 * jax.random.normal(kb, (actions,), dtype=jnp.float32),
    )
    return params


if __name__ == "__main__":
    # Small shapes consistent with the module's forward:
    #   spatial (B, P, H, W, C), non-spatial (B, F_ns), mask (B, A)
    B = 2
    spatial_input_shape = (2, 3, 4, 4)      # P, H, W, C  -> 96 features
    non_spatial_input_shape = (32,)         # 32 features -> total F = 128
    hidden_layers = [64, 32]
    players = 2                             # value_output_shape = (2,)
    actions = 26                            # policy_output_shape = (26,)

    in_features = math.prod(spatial_input_shape) + math.prod(non_spatial_input_shape)

    key = jax.random.PRNGKey(0)
    k_sp, k_ns, k_mask, k_par = jax.random.split(key, 4)

    spatial = jax.random.normal(k_sp, (B,) + spatial_input_shape, dtype=jnp.float32)
    non_spatial = jax.random.normal(k_ns, (B,) + non_spatial_input_shape, dtype=jnp.float32)
    mask = (jax.random.uniform(k_mask, (B, actions)) > 0.3).astype(jnp.float32)

    params = init_params(k_par, in_features, hidden_layers, players, actions)

    # One-time weight prep (hoisted out of the per-call path), then jitted forward.
    prepared = prepare_skynet_params(params, in_features)
    forward = make_skynet_forward(prepared)

    value, points, policy = forward(spatial, non_spatial, mask)
    jax.block_until_ready((value, points, policy))

    # Structural sanity checks.
    assert value.shape == (B, players) and points.shape == (B, players)
    assert policy.shape == (B, actions)
    assert jnp.allclose(jnp.sum(value, axis=-1), 1.0, atol=1e-3)  # exact divide
    assert jnp.all(points == 0.0)
    assert jnp.all(jnp.where(mask == 0, policy == -1e10, True))

    # Numerical check vs pure-JAX f32 reference (loose tol: bf16 matmuls).
    v_ref, _, p_ref = reference_forward(spatial, non_spatial, mask, params)
    assert jnp.allclose(value, v_ref, atol=5e-2), float(jnp.max(jnp.abs(value - v_ref)))
    assert jnp.allclose(policy, p_ref, atol=1e-1, rtol=1e-3), \
        float(jnp.max(jnp.abs(policy - p_ref)))

    print("KERNEL_OK")
</pallas_src>

<mosaic_0001>
module attributes {stable_mosaic.version = 11 : i64} {
  func.func @kernel(%arg0: i32, %arg1: memref<16x128xbf16, #tpu.memory_space<vmem>>, %arg2: memref<16x128xbf16, #tpu.memory_space<vmem>>, %arg3: memref<128x128xbf16, #tpu.memory_space<vmem>>, %arg4: memref<1x128xf32, #tpu.memory_space<vmem>>, %arg5: memref<128x128xbf16, #tpu.memory_space<vmem>>, %arg6: memref<1x128xf32, #tpu.memory_space<vmem>>, %arg7: memref<128x256xbf16, #tpu.memory_space<vmem>>, %arg8: memref<1x256xf32, #tpu.memory_space<vmem>>, %arg9: memref<16x256xf32, #tpu.memory_space<vmem>>) attributes {dimension_semantics = [#tpu.dimension_semantics<parallel>], iteration_bounds = array<i64: 1>, scalar_prefetch = 0 : i64, scratch_operands = 0 : i64, tpu.core_type = #tpu.core_type<tc>, window_params = [{transform_indices = @transform_0, window_bounds = array<i64: 16, 128>}, {transform_indices = @transform_1, window_bounds = array<i64: 16, 128>}, {pipeline_mode = #tpu.pipeline_mode<synchronous>, transform_indices = @transform_2, window_bounds = array<i64: 128, 128>}, {pipeline_mode = #tpu.pipeline_mode<synchronous>, transform_indices = @transform_3, window_bounds = array<i64: 1, 128>}, {pipeline_mode = #tpu.pipeline_mode<synchronous>, transform_indices = @transform_4, window_bounds = array<i64: 128, 128>}, {pipeline_mode = #tpu.pipeline_mode<synchronous>, transform_indices = @transform_5, window_bounds = array<i64: 1, 128>}, {pipeline_mode = #tpu.pipeline_mode<synchronous>, transform_indices = @transform_6, window_bounds = array<i64: 128, 256>}, {pipeline_mode = #tpu.pipeline_mode<synchronous>, transform_indices = @transform_7, window_bounds = array<i64: 1, 256>}, {transform_indices = @transform_8, window_bounds = array<i64: 16, 256>}]} {
    %c0 = arith.constant 0 : index
    %c0_0 = arith.constant 0 : index
    %0 = vector.load %arg1[%c0, %c0_0] : memref<16x128xbf16, #tpu.memory_space<vmem>>, vector<16x128xbf16>
    %c0_1 = arith.constant 0 : index
    %c0_2 = arith.constant 0 : index
    %1 = vector.load %arg3[%c0_1, %c0_2] : memref<128x128xbf16, #tpu.memory_space<vmem>>, vector<128x128xbf16>
    %c0_3 = arith.constant 0 : index
    %c0_4 = arith.constant 0 : index
    %2 = vector.load %arg4[%c0_3, %c0_4] : memref<1x128xf32, #tpu.memory_space<vmem>>, vector<1x128xf32>
    %cst = arith.constant dense<0.000000e+00> : vector<16x128xf32>
    %3 = tpu.matmul %0, %1, %cst {dimension_numbers = #tpu.dot_dimension_numbers<[1], [0], [0], [1], [0, 0, 1, 1], [], []>} : vector<16x128xbf16>, vector<128x128xbf16>, vector<16x128xf32> -> vector<16x128xf32>
    %4 = vector.broadcast %2 : vector<1x128xf32> to vector<16x128xf32>
    %5 = arith.addf %3, %4 : vector<16x128xf32>
    %cst_5 = arith.constant 0.000000e+00 : f32
    %6 = vector.broadcast %cst_5 : f32 to vector<16x128xf32>
    %7 = arith.maximumf %5, %6 : vector<16x128xf32>
    %8 = arith.truncf %7 : vector<16x128xf32> to vector<16x128xbf16>
    %c0_6 = arith.constant 0 : index
    %c0_7 = arith.constant 0 : index
    %9 = vector.load %arg5[%c0_6, %c0_7] : memref<128x128xbf16, #tpu.memory_space<vmem>>, vector<128x128xbf16>
    %c0_8 = arith.constant 0 : index
    %c0_9 = arith.constant 0 : index
    %10 = vector.load %arg6[%c0_8, %c0_9] : memref<1x128xf32, #tpu.memory_space<vmem>>, vector<1x128xf32>
    %cst_10 = arith.constant dense<0.000000e+00> : vector<16x128xf32>
    %11 = tpu.matmul %8, %9, %cst_10 {dimension_numbers = #tpu.dot_dimension_numbers<[1], [0], [0], [1], [0, 0, 1, 1], [], []>} : vector<16x128xbf16>, vector<128x128xbf16>, vector<16x128xf32> -> vector<16x128xf32>
    %12 = vector.broadcast %10 : vector<1x128xf32> to vector<16x128xf32>
    %13 = arith.addf %11, %12 : vector<16x128xf32>
    %cst_11 = arith.constant 0.000000e+00 : f32
    %14 = vector.broadcast %cst_11 : f32 to vector<16x128xf32>
    %15 = arith.maximumf %13, %14 : vector<16x128xf32>
    %16 = arith.truncf %15 : vector<16x128xf32> to vector<16x128xbf16>
    %c0_12 = arith.constant 0 : index
    %c0_13 = arith.constant 0 : index
    %17 = vector.load %arg7[%c0_12, %c0_13] : memref<128x256xbf16, #tpu.memory_space<vmem>>, vector<128x256xbf16>
    %c0_14 = arith.constant 0 : index
    %c0_15 = arith.constant 0 : index
    %18 = vector.load %arg8[%c0_14, %c0_15] : memref<1x256xf32, #tpu.memory_space<vmem>>, vector<1x256xf32>
    %cst_16 = arith.constant dense<0.000000e+00> : vector<16x256xf32>
    %19 = tpu.matmul %16, %17, %cst_16 {dimension_numbers = #tpu.dot_dimension_numbers<[1], [0], [0], [1], [0, 0, 1, 1], [], []>} : vector<16x128xbf16>, vector<128x256xbf16>, vector<16x256xf32> -> vector<16x256xf32>
    %20 = vector.broadcast %18 : vector<1x256xf32> to vector<16x256xf32>
    %21 = arith.addf %19, %20 : vector<16x256xf32>
    %22 = vector.extract_strided_slice %21 {offsets = [0, 0], sizes = [16, 128], strides = [1, 1]} : vector<16x256xf32> to vector<16x128xf32>
    %cst_17 = arith.constant dense<0xFF800000> : vector<16xf32>
    %23 = vector.multi_reduction <maximumf>, %22, %cst_17 [1] : vector<16x128xf32> to vector<16xf32>
    %24 = vector.shape_cast %23 : vector<16xf32> to vector<16x1xf32>
    %25 = vector.broadcast %24 : vector<16x1xf32> to vector<16x128xf32>
    %26 = arith.subf %22, %25 : vector<16x128xf32>
    %27 = math.exp %26 : vector<16x128xf32>
    %cst_18 = arith.constant dense<0.000000e+00> : vector<16xf32>
    %28 = vector.multi_reduction <add>, %27, %cst_18 [1] : vector<16x128xf32> to vector<16xf32>
    %29 = vector.shape_cast %28 : vector<16xf32> to vector<16x1xf32>
    %30 = vector.broadcast %29 : vector<16x1xf32> to vector<16x128xf32>
    %31 = arith.divf %27, %30 : vector<16x128xf32>
    %c0_19 = arith.constant 0 : index
    %c0_20 = arith.constant 0 : index
    %32 = vector.load %arg9[%c0_19, %c0_20] : memref<16x256xf32, #tpu.memory_space<vmem>>, vector<16x128xf32>
    tpu.vector_store %arg9[%c0_19, %c0_20], %31 {strides = array<i32>} : memref<16x256xf32, #tpu.memory_space<vmem>>, vector<16x128xf32>,
    %33 = vector.extract_strided_slice %21 {offsets = [0, 128], sizes = [16, 128], strides = [1, 1]} : vector<16x256xf32> to vector<16x128xf32>
    %c0_21 = arith.constant 0 : index
    %c0_22 = arith.constant 0 : index
    %34 = vector.load %arg2[%c0_21, %c0_22] : memref<16x128xbf16, #tpu.memory_space<vmem>>, vector<16x128xbf16>
    %cst_23 = arith.constant 0.000000e+00 : bf16
    %35 = vector.broadcast %cst_23 : bf16 to vector<16x128xbf16>
    %36 = arith.cmpf one, %34, %35 : vector<16x128xbf16>
    %cst_24 = arith.constant -1.000000e+10 : f32
    %37 = vector.broadcast %cst_24 : f32 to vector<16x128xf32>
    %38 = arith.select %36, %33, %37 : vector<16x128xi1>, vector<16x128xf32>
    %c0_25 = arith.constant 0 : index
    %c128 = arith.constant 128 : index
    %39 = vector.load %arg9[%c0_25, %c128] : memref<16x256xf32, #tpu.memory_space<vmem>>, vector<16x128xf32>
    tpu.vector_store %arg9[%c0_25, %c128], %38 {strides = array<i32>} : memref<16x256xf32, #tpu.memory_space<vmem>>, vector<16x128xf32>,
    return
  }
  func.func @transform_0(%arg0: i32) -> (i32, i32) {
    %c0_i32 = arith.constant 0 : i32
    %c0_i32_0 = arith.constant 0 : i32
    return %arg0, %c0_i32 : i32, i32
  }
  func.func @transform_1(%arg0: i32) -> (i32, i32) {
    %c0_i32 = arith.constant 0 : i32
    %c0_i32_0 = arith.constant 0 : i32
    return %arg0, %c0_i32 : i32, i32
  }
  func.func @transform_2(%arg0: i32) -> (i32, i32) {
    %c0_i32 = arith.constant 0 : i32
    %c0_i32_0 = arith.constant 0 : i32
    %c0_i32_1 = arith.constant 0 : i32
    return %c0_i32, %c0_i32_0 : i32, i32
  }
  func.func @transform_3(%arg0: i32) -> (i32, i32) {
    %c0_i32 = arith.constant 0 : i32
    %c0_i32_0 = arith.constant 0 : i32
    %c0_i32_1 = arith.constant 0 : i32
    return %c0_i32, %c0_i32_0 : i32, i32
  }
  func.func @transform_4(%arg0: i32) -> (i32, i32) {
    %c0_i32 = arith.constant 0 : i32
    %c0_i32_0 = arith.constant 0 : i32
    %c0_i32_1 = arith.constant 0 : i32
    return %c0_i32, %c0_i32_0 : i32, i32
  }
  func.func @transform_5(%arg0: i32) -> (i32, i32) {
    %c0_i32 = arith.constant 0 : i32
    %c0_i32_0 = arith.constant 0 : i32
    %c0_i32_1 = arith.constant 0 : i32
    return %c0_i32, %c0_i32_0 : i32, i32
  }
  func.func @transform_6(%arg0: i32) -> (i32, i32) {
    %c0_i32 = arith.constant 0 : i32
    %c0_i32_0 = arith.constant 0 : i32
    %c0_i32_1 = arith.constant 0 : i32
    return %c0_i32, %c0_i32_0 : i32, i32
  }
  func.func @transform_7(%arg0: i32) -> (i32, i32) {
    %c0_i32 = arith.constant 0 : i32
    %c0_i32_0 = arith.constant 0 : i32
    %c0_i32_1 = arith.constant 0 : i32
    return %c0_i32, %c0_i32_0 : i32, i32
  }
  func.func @transform_8(%arg0: i32) -> (i32, i32) {
    %c0_i32 = arith.constant 0 : i32
    %c0_i32_0 = arith.constant 0 : i32
    return %arg0, %c0_i32 : i32, i32
  }
}

</mosaic_0001>

<bundles_post_ra>
// kernel: forward.1
= control target key start
LH: loop header
LB: loop body
LE: loop exit
PB: predicated region body
PF: predicated region fallthrough
CT: control target
= control target key end

     0   :  { %13 = vsyncpa [#allocation3], 0  ;;  %s818_s0 = inlined_call_operand.vmem [shape: bf16[16,128], index: 0, kind: input, shape index: {}]   ;;  %s819_s1 = inlined_call_operand.vmem [shape: bf16[16,128], index: 1, kind: input, shape index: {}]   ;;  %s820_s2 = inlined_call_operand.hbm [shape: bf16[128,128], index: 2, kind: input, shape index: {}]   ;;  %s821_s3 = inlined_call_operand.vmem [shape: f32[1,128], index: 3, kind: input, shape index: {}]   ;;  %s822_s4 = inlined_call_operand.hbm [shape: bf16[128,128], index: 4, kind: input, shape index: {}]   ;;  %s823_s5 = inlined_call_operand.vmem [shape: f32[1,128], index: 5, kind: input, shape index: {}]   ;;  %s824_s6 = inlined_call_operand.vmem [shape: bf16[128,256], index: 6, kind: input, shape index: {}]   ;;  %s825_s7 = inlined_call_operand.vmem [shape: f32[1,256], index: 7, kind: input, shape index: {}]   ;;  %s826_s8 = inlined_call_operand.vmem [shape: f32[16,256], index: 8, kind: output, shape index: {}]  }
   0x1   :  { %14 = vsyncpa [#allocation5], 0  ;;  %s682_s27 = smov [#allocation2]  }
   0x2   :  { %s24_s28 = sshll.u32 %s682_s27, 4  ;;  %s25_s28 = int_to_ptr.vmem [resolvable:$true] %s24_s28 }
   0x3   :  { %s646_s29 = scalar_lea.vmem %s25_s28, 1024  ;;  %p651_p1 = scmp.lt.s32.totalorder %s25_s28, %s25_s28 }
   0x4   :  { %p647_p0 = scmp.ne.s32.totalorder %s25_s28, %s646_s29  ;;  %p652_p2 = scmp.lt.s32.totalorder %s646_s29, %s646_s29 }
   0x6   :  { %p653_p3 = por %p652_p2, %p651_p1 }
   0x8   :  { %p654_p4 = pnand %p653_p3, %p647_p0 }
   0xa   :  { %657 = shalt.err (!%p654_p4)
}
   0xb   :  { %s683_s30 = smov 64   ;;  %s684_s9 = smov 4  }
   0xc   :  { %30 = dma.hbm_to_vmem [thread:$0]  %s820_s2, 1024, %s25_s28, [#allocation3], %s683_s30, %s683_s30, %s684_s9  }
   0xd   :  { %s685_s12 = smov [#allocation4]  }
   0xe   :  { %s38_s13 = sshll.u32 %s685_s12, 4  ;;  %s39_s13 = int_to_ptr.vmem [resolvable:$true] %s38_s13 }
   0xf   :  { %s666_s14 = scalar_lea.vmem %s39_s13, 1024  ;;  %p671_p6 = scmp.lt.s32.totalorder %s39_s13, %s39_s13 }
  0x10   :  { %p667_p5 = scmp.ne.s32.totalorder %s39_s13, %s666_s14  ;;  %p672_p7 = scmp.lt.s32.totalorder %s666_s14, %s666_s14 }
  0x12   :  { %p673_p8 = por %p672_p7, %p671_p6 }
  0x14   :  { %p674_p9 = pnand %p673_p8, %p667_p5 }
  0x16   :  { %677 = shalt.err (!%p674_p9)
}
  0x17   :  { %44 = dma.hbm_to_vmem [thread:$0]  %s822_s4, 1024, %s39_s13, [#allocation5], %s683_s30, %s683_s30, %s684_s9  }
  0x18   :  { %678 = dma.done.wait [#allocation3], 1024  }
  0x19   :  { %679 = vsyncadd [#allocation3], 4294966272 }
  0x1a   :  { %680 = dma.done.wait [#allocation5], 1024  }
  0x1b   :  { %681 = vsyncadd [#allocation5], 4294966272  ;;  %v686_v0 = vmov 0.0   ;;  %vm687_vm0 = vmmov 0   ;;  %v589_v1 = vld [vmem:[#allocation2 + $0x38] sm:$0xff]   ;;  %v590_v2 = vld [vmem:[#allocation2 + $0x30] sm:$0xff]   ;;  %v316_v55 = vlaneseq }
  0x1c   :  { %542 = vmatprep.subr.bf16.mxu0 %v686_v0  ;;  %558 = vmatprep.mubr.msk.bf16.mxu0 %vm687_vm0, %v686_v0  ;;  %v591_v3 = vld [vmem:[#allocation2 + $0x28] sm:$0xff]   ;;  %v598_v4 = vld [vmem:[#allocation4 + $0x38] sm:$0xff]   ;;  %v592_v5 = vld [vmem:[#allocation2 + $0x20] sm:$0xff]   ;;  %v688_v44 = vmov 0  }
  0x1d   :  { %562 = vmatprep.subr.bf16.mxu1 %v686_v0  ;;  %578 = vmatprep.mubr.msk.bf16.mxu1 %vm687_vm0, %v686_v0  ;;  %v599_v6 = vld [vmem:[#allocation4 + $0x30] sm:$0xff]   ;;  %v593_v7 = vld [vmem:[#allocation2 + $0x18] sm:$0xff]   ;;  %v600_v8 = vld [vmem:[#allocation4 + $0x28] sm:$0xff]   ;;  %v317_v57 = vshrl.u32 %v316_v55, 7 }
  0x1e   :  { %543 = vmatpush3.bf16.msra.mxu0 %v589_v1  ;;  %563 = vmatpush3.bf16.msra.mxu1 %v598_v4  ;;  %v594_v9 = vld [vmem:[#allocation2 + $0x10] sm:$0xff]   ;;  %v601_v10 = vld [vmem:[#allocation4 + $0x20] sm:$0xff]   ;;  %v595_v11 = vld [vmem:[#allocation2 + $0x8] sm:$0xff]  }
  0x1f   :  { %544 = vmatprep.subr.bf16.mxu0 %v686_v0  ;;  %564 = vmatprep.subr.bf16.mxu1 %v686_v0  ;;  %v602_v12 = vld [vmem:[#allocation4 + $0x18] sm:$0xff]   ;;  %v596_v13 = vld [vmem:[#allocation2] sm:$0xff]   ;;  %v603_v15 = vld [vmem:[#allocation4 + $0x10] sm:$0xff]   ;;  %v318_v59 = vsub.s32 0, %v317_v57  ;;  %v322_v62 = vsub.s32 1, %v317_v57 }
  0x20   :  { %v597_v14 = vld [vmem:[%s818_s0] sm:$0xff]   ;;  %v604_v16 = vld [vmem:[#allocation4 + $0x8] sm:$0xff]   ;;  %v606_v18 = vld [vmem:[%s824_s6 + $0x70] ss:$8 sps:$4 sm:$0xff]  }
  0x21   :  { %v605_v17 = vld [vmem:[#allocation4] sm:$0xff]   ;;  %v608_v19 = vld [vmem:[%s824_s6 + $0x74] ss:$8 sps:$4 sm:$0xff]   ;;  %v612_v23 = vld [vmem:[%s824_s6 + $0x50] ss:$8 sps:$4 sm:$0xff]  }
  0x22   :  { %545 = vmatpush3.bf16.msra.mxu0 %v590_v2  ;;  %565 = vmatpush3.bf16.msra.mxu1 %v599_v6  ;;  %v611_v20 = vld [vmem:[%s824_s6 + $0x64] ss:$8 sps:$4 sm:$0xff]   ;;  %v609_v21 = vld [vmem:[%s824_s6 + $0x60] ss:$8 sps:$4 sm:$0xff]   ;;  %v614_v22 = vld [vmem:[%s824_s6 + $0x54] ss:$8 sps:$4 sm:$0xff]  }
  0x23   :  { %546 = vmatprep.subr.bf16.mxu0 %v686_v0  ;;  %566 = vmatprep.subr.bf16.mxu1 %v686_v0  ;;  %v617_v24 = vld [vmem:[%s824_s6 + $0x44] ss:$8 sps:$4 sm:$0xff]   ;;  %v615_v25 = vld [vmem:[%s824_s6 + $0x40] ss:$8 sps:$4 sm:$0xff]   ;;  %v620_v26 = vld [vmem:[%s824_s6 + $0x34] ss:$8 sps:$4 sm:$0xff]  }
  0x24   :  { %v618_v27 = vld [vmem:[%s824_s6 + $0x30] ss:$8 sps:$4 sm:$0xff]   ;;  %v623_v28 = vld [vmem:[%s824_s6 + $0x24] ss:$8 sps:$4 sm:$0xff]   ;;  %v621_v29 = vld [vmem:[%s824_s6 + $0x20] ss:$8 sps:$4 sm:$0xff]  }
  0x25   :  { %v489_v30 = vld [vmem:[%s821_s3] ss:$0 sm:$0xff]  ;;  %v626_v40 = vld [vmem:[%s824_s6 + $0x14] ss:$8 sps:$4 sm:$0xff]   ;;  %v624_v41 = vld [vmem:[%s824_s6 + $0x10] ss:$8 sps:$4 sm:$0xff]  }
  0x26   :  { %547 = vmatpush3.bf16.msra.mxu0 %v591_v3  ;;  %567 = vmatpush3.bf16.msra.mxu1 %v600_v8  ;;  %v629_v42 = vld [vmem:[%s824_s6 + $0x4] ss:$8 sps:$4 sm:$0xff]   ;;  %v627_v43 = vld [vmem:[%s824_s6] ss:$8 sps:$4 sm:$0xff]  }
  0x27   :  { %548 = vmatprep.subr.bf16.mxu0 %v686_v0  ;;  %568 = vmatprep.subr.bf16.mxu1 %v686_v0  ;;  %v499_v45 = vld [vmem:[%s823_s5] ss:$0 sm:$0xff]  ;;  %v470_v58 = vld [vmem:[%s819_s1 + $0x4] sm:$0xf] }
  0x28   :  { %v469_v56 = vld [vmem:[%s819_s1] sm:$0xf]  ;;  %vm472_vm2 = vcmp.ne.bf16.partialorder %v470_v58, 0 }
  0x29   :  { %vm471_vm1 = vcmp.ne.bf16.partialorder %v469_v56, 0  ;;  %v314_v60 = vld [vmem:[%s825_s7] sm:$0x3]  ;;  %v474_v1 = vsel %vm472_vm2, 65537, %v688_v44 }
  0x2a   :  { %549 = vmatpush3.bf16.msra.mxu0 %v592_v5  ;;  %569 = vmatpush3.bf16.msra.mxu1 %v601_v10  ;;  %v473_v61 = vsel %vm471_vm1, 65537, %v688_v44  ;;  %v319_v63 = vrot.slane %v314_v60, %v318_v59  ;;  %v323_v2 = vrot.slane %v314_v60, %v322_v62  ;;  %v476_v6 = vunpack.c.l.b16 %v474_v1 }
  0x2b   :  { %550 = vmatprep.subr.bf16.mxu0 %v686_v0  ;;  %570 = vmatprep.subr.bf16.mxu1 %v686_v0 }
  0x2c   :  { %vm478_vm4 = vcmp.ne.s32.totalorder %v476_v6, 0 }
  0x2e   :  { %551 = vmatpush3.bf16.msra.mxu0 %v593_v7  ;;  %571 = vmatpush3.bf16.msra.mxu1 %v602_v12 }
  0x2f   :  { %552 = vmatprep.subr.bf16.mxu0 %v686_v0  ;;  %572 = vmatprep.subr.bf16.mxu1 %v686_v0 }
  0x32   :  { %553 = vmatpush3.bf16.msra.mxu0 %v594_v9  ;;  %573 = vmatpush3.bf16.msra.mxu1 %v603_v15 }
  0x33   :  { %554 = vmatprep.subr.bf16.mxu0 %v686_v0  ;;  %574 = vmatprep.subr.bf16.mxu1 %v686_v0 }
  0x36   :  { %555 = vmatpush3.bf16.msra.mxu0 %v595_v11  ;;  %575 = vmatpush3.bf16.msra.mxu1 %v604_v16 }
  0x37   :  { %556 = vmatprep.subr.bf16.mxu0 %v686_v0  ;;  %576 = vmatprep.subr.bf16.mxu1 %v686_v0  ;;  %v475_v0 = vunpack.c.l.b16 %v473_v61 }
  0x39   :  { %vm477_vm3 = vcmp.ne.s32.totalorder %v475_v0, 0 }
  0x3a   :  { %557 = vmatpush3.bf16.msra.mxu0 %v596_v13  ;;  %577 = vmatpush3.bf16.msra.mxu1 %v605_v17 }
  0x3b   :  { %406 = vmatprep.subr.bf16.mxu0 %v608_v19 }
  0x3d   :  { %559 = vmatmul.mubr.bf16.vlgmr.msra.gmra.mxu0 %v597_v14 }
  0x3e   :  { %407 = vmatpush1.bf16.msra.mxu0 %v606_v18  ;;  %438 = vmatprep.mubr.bf16.mxu0 %v688_v44 }
  0x3f   :  { %408 = vmatprep.subr.bf16.mxu0 %v611_v20 }
  0x42   :  { %409 = vmatpush1.bf16.msra.mxu0 %v609_v21 }
  0x43   :  { %410 = vmatprep.subr.bf16.mxu0 %v614_v22 }
  0x46   :  { %411 = vmatpush1.bf16.msra.mxu0 %v612_v23 }
  0x47   :  { %412 = vmatprep.subr.bf16.mxu0 %v617_v24 }
  0x4a   :  { %413 = vmatpush1.bf16.msra.mxu0 %v615_v25 }
  0x4b   :  { %414 = vmatprep.subr.bf16.mxu0 %v620_v26 }
  0x4e   :  { %415 = vmatpush1.bf16.msra.mxu0 %v618_v27 }
  0x4f   :  { %416 = vmatprep.subr.bf16.mxu0 %v623_v28 }
  0x52   :  { %417 = vmatpush1.bf16.msra.mxu0 %v621_v29 }
  0x53   :  { %418 = vmatprep.subr.bf16.mxu0 %v626_v40 }
  0x56   :  { %419 = vmatpush1.bf16.msra.mxu0 %v624_v41 }
  0x57   :  { %420 = vmatprep.subr.bf16.mxu0 %v629_v42 }
  0x5a   :  { %421 = vmatpush1.bf16.msra.mxu0 %v627_v43 }
  0xfd   :  { %v173_v31 = vpop.f32.mrf.mxu0 }
  0xfe   :  { %v174_v33 = vadd.f32 %v489_v30, %v173_v31 }
  0xff   :  { %v560_v32 = vpop.f32.mrf.mxu0 }
 0x100   :  { %v180_v37 = vmax.f32 %v174_v33, 0.0 }
 0x101   :  { %v176_v34 = vpop.f32.mrf.mxu0 }
 0x102   :  { %v177_v35 = vadd.f32 %v489_v30, %v176_v34 }
 0x103   :  { %v561_v36 = vpop.f32.mrf.mxu0 }
 0x104   :  { %v181_v38 = vmax.f32 %v177_v35, 0.0 }
 0x106   :  { %v182_v39 = vpack.c.bf16 %v181_v38, %v180_v37 }
 0x108   :  { %579 = vmatmul.mubr.bf16.vlgmr.msra.gmra.mxu1 %v182_v39 }
 0x1c8   :  { %v288_v46 = vpop.f32.mrf.mxu1 }
 0x1c9   :  { %v289_v48 = vadd.f32 %v499_v45, %v288_v46 }
 0x1ca   :  { %v580_v47 = vpop.f32.mrf.mxu1 }
 0x1cb   :  { %v295_v52 = vmax.f32 %v289_v48, 0.0 }
 0x1cc   :  { %v291_v49 = vpop.f32.mrf.mxu1 }
 0x1cd   :  { %v292_v50 = vadd.f32 %v499_v45, %v291_v49 }
 0x1ce   :  { %v581_v51 = vpop.f32.mrf.mxu1 }
 0x1cf   :  { %v296_v53 = vmax.f32 %v292_v50, 0.0 }
 0x1d1   :  { %v297_v54 = vpack.c.bf16 %v296_v53, %v295_v52 }
 0x1d3   :  { %439 = vmatmul.mubr.bf16.vlgmr.msra.gmra.mxu0 %v297_v54 }
 0x293   :  { %v440_v3 = vpop.f32.mrf.mxu0 }
 0x294   :  { %v441_v4 = vadd.f32 %v440_v3, %v319_v63 }
 0x295   :  { %v442_v5 = vpop.f32.mrf.mxu0 }
 0x296   :  { %v443_v7 = vadd.f32 %v442_v5, %v323_v2  ;;  %449 = vmax.xlane.f32.xlu0 %v441_v4 }
 0x297   :  { %v444_v8 = vpop.f32.mrf.mxu0 }
 0x298   :  { %v479_v9 = vsel %vm477_vm3, %v443_v7, -1e+10  ;;  %v445_v10 = vadd.f32 %v444_v8, %v319_v63 }
 0x299   :  { %481 = vst [vmem:[%s826_s8 + $0x8] sm:$0xff] %v479_v9  ;;  %v446_v11 = vpop.f32.mrf.mxu0 }
 0x29a   :  { %v447_v12 = vadd.f32 %v446_v11, %v323_v2  ;;  %451 = vmax.xlane.f32.xlu0 %v445_v10 }
 0x29c   :  { %v480_v13 = vsel %vm478_vm4, %v447_v12, -1e+10 }
 0x29d   :  { %482 = vst [vmem:[%s826_s8 + $0x18] sm:$0xff] %v480_v13 }
 0x31f   :  { %v450_v14 = vpop.xlane.xlu0 %449 }
 0x320   :  { %v453_v15 = vsub.f32 %v441_v4, %v450_v14 }
 0x322   :  { %v455_v16 = vmul.f32 1.442695, %v453_v15 }
 0x323   :  { %v452_v17 = vpop.xlane.xlu0 %451 }
 0x324   :  { %630 = vpow2.f32 %v455_v16  ;;  %v454_v18 = vsub.f32 %v445_v10, %v452_v17 }
 0x326   :  { %v457_v19 = vmul.f32 1.442695, %v454_v18 }
 0x328   :  { %632 = vpow2.f32 %v457_v19 }
 0x331   :  { %v631_v20 = vpop.eup %630 }
 0x332   :  { %459 = vadd.xlane.f32.xlu1 %v631_v20 }
 0x335   :  { %v633_v21 = vpop.eup %632 }
 0x336   :  { %461 = vadd.xlane.f32.xlu1 %v633_v21 }
 0x3bb   :  { %v460_v22 = vpop.xlane.xlu1 %459 }
 0x3bc   :  { %634 = vrcp.f32 %v460_v22 }
 0x3bf   :  { %v462_v23 = vpop.xlane.xlu1 %461 }
 0x3c0   :  { %636 = vrcp.f32 %v462_v23 }
 0x3c9   :  { %v635_v24 = vpop.eup %634 }
 0x3ca   :  { %v464_v25 = vmul.f32 %v635_v24, %v631_v20 }
 0x3cc   :  { %467 = vst [vmem:[%s826_s8] sm:$0xff] %v464_v25 }
 0x3cd   :  { %v637_v26 = vpop.eup %636 }
 0x3ce   :  { %v466_v27 = vmul.f32 %v637_v26, %v633_v21 }
 0x3d0   :  { %468 = vst [vmem:[%s826_s8 + $0x10] sm:$0xff] %v466_v27 }
 0x3d1   :  { %487 = vsyncpa [#allocation3], 1 }
 0x3d2   :  { %488 = vsyncpa [#allocation5], 1 }

</bundles_post_ra>
